<compile_context>
chip_gen: v7x
topology: tpu7x:2x2x1
jax: 0.10.0
libtpu: 0.0.40
codegen_flags: <defaults>
</compile_context>

<pallas_src>
import jax
import jax.numpy as jnp
from jax import lax
from jax.experimental import pallas as pl
from jax.experimental.pallas import tpu as pltpu

_NORM_EPS = 1e-12  # F.normalize default eps
_COS_EPS = 1e-8    # F.cosine_similarity default eps


def _cos_dist_sim_kernel(x1_ref, x2_ref, sim_ref):
    """Per-row cosine similarity of L2-normalized rows for one batch tile."""
    x1 = x1_ref[...].astype(jnp.float32)
    x2 = x2_ref[...].astype(jnp.float32)

    # Three lane reductions per tile; the normalized tiles never exist.
    s1 = jnp.sum(x1 * x1, axis=1, keepdims=True)   # (bb, 1)
    s2 = jnp.sum(x2 * x2, axis=1, keepdims=True)   # (bb, 1)
    d = jnp.sum(x1 * x2, axis=1, keepdims=True)    # (bb, 1)

    # F.normalize(p=2, dim=1): x / max(||x||, 1e-12)
    #   inv_i = 1 / max(||x_i||, 1e-12) = rsqrt(max(s_i, 1e-24))
    eps2 = jnp.float32(_NORM_EPS * _NORM_EPS)
    inv1 = lax.rsqrt(jnp.maximum(s1, eps2))
    inv2 = lax.rsqrt(jnp.maximum(s2, eps2))

    # cosine_similarity of the *normalized* vectors (per-norm clamp at 1e-8):
    #   dot(x1n, x2n) = d * inv1 * inv2
    #   ||x1n||       = sqrt(s1) * inv1,   ||x2n|| = sqrt(s2) * inv2
    dotn = d * (inv1 * inv2)
    m1 = jnp.sqrt(s1) * inv1
    m2 = jnp.sqrt(s2) * inv2
    sim_ref[...] = dotn / (jnp.maximum(m1, _COS_EPS) * jnp.maximum(m2, _COS_EPS))


def _choose_block_b(B, D, *, max_rows=2048, vmem_budget_bytes=32 << 20):
    """Largest batch tile that divides B, is a multiple of 8, and fits budget."""
    padded_d = pl.cdiv(D, 128) * 128
    # 2 inputs x 2 pipeline buffers x f32 rows (lane-padded).
    bytes_per_row = 2 * 2 * padded_d * 4
    cap = min(max_rows, max(8, vmem_budget_bytes // bytes_per_row))
    cap = (cap // 8) * 8
    if B <= cap:
        return B
    for bb in range(cap, 7, -8):  # multiples of 8 only (cap is a multiple of 8)
        if B % bb == 0:
            return bb
    # No divisor of B that is a multiple of 8 and <= cap: fall back to a single
    # full-batch block (always layout-legal). Ragged tiling is unsupported;
    # pad the batch externally for very large, awkward B.
    return B


def cos_dist_loss(latent1, latent2, *, block_b=None):
    """Pallas implementation of CosDistLoss.forward for (B, D) latents."""
    assert latent1.shape == latent2.shape and latent1.ndim == 2
    B, D = latent1.shape
    if block_b is None:
        block_b = _choose_block_b(B, D)
    assert B % block_b == 0, "batch must be a multiple of the batch tile"

    padded_d = pl.cdiv(D, 128) * 128
    # 2 inputs, double-buffered, f32, plus slack for the tiny output slices.
    vmem_bytes = 2 * 2 * block_b * padded_d * 4 + (2 << 20)
    # Clamp to a range that is safe on v5e/v6e (128 MiB) and v7x (64 MiB).
    vmem_limit = int(min(max(vmem_bytes, 16 << 20), 48 << 20))

    sims = pl.pallas_call(
        _cos_dist_sim_kernel,
        out_shape=jax.ShapeDtypeStruct((B, 1), jnp.float32),
        grid_spec=pltpu.PrefetchScalarGridSpec(
            num_scalar_prefetch=0,
            grid=(B // block_b,),
            in_specs=[
                pl.BlockSpec((block_b, D), lambda i: (i, 0)),
                pl.BlockSpec((block_b, D), lambda i: (i, 0)),
            ],
            out_specs=pl.BlockSpec((block_b, 1), lambda i: (i, 0)),
        ),
        compiler_params=pltpu.CompilerParams(
            dimension_semantics=("parallel",),  # independent batch tiles
            vmem_limit_bytes=vmem_limit,
        ),
    )(latent1, latent2)

    return 1.0 - jnp.mean(sims)


def _reference(latent1, latent2):
    """Pure-JAX reference mirroring the PyTorch forward (unfused)."""
    n1 = jnp.sqrt(jnp.sum(latent1 * latent1, axis=1, keepdims=True))
    n2 = jnp.sqrt(jnp.sum(latent2 * latent2, axis=1, keepdims=True))
    x1n = latent1 / jnp.maximum(n1, _NORM_EPS)
    x2n = latent2 / jnp.maximum(n2, _NORM_EPS)
    dot = jnp.sum(x1n * x2n, axis=1)
    m1 = jnp.sqrt(jnp.sum(x1n * x1n, axis=1))
    m2 = jnp.sqrt(jnp.sum(x2n * x2n, axis=1))
    sim = dot / (jnp.maximum(m1, _COS_EPS) * jnp.maximum(m2, _COS_EPS))
    return 1.0 - jnp.mean(sim)


if __name__ == "__main__":
    key = jax.random.PRNGKey(0)
    k1, k2 = jax.random.split(key)
    B, D = 16, 32  # small latent: batch=16, hidden=32
    latent1 = jax.random.normal(k1, (B, D), dtype=jnp.float32)
    latent2 = jax.random.normal(k2, (B, D), dtype=jnp.float32)

    loss = cos_dist_loss(latent1, latent2)
    jax.block_until_ready(loss)

    ref = _reference(latent1, latent2)
    assert jnp.allclose(loss, ref, atol=1e-5, rtol=1e-5), (loss, ref)

    print("KERNEL_OK")
</pallas_src>

<mosaic_0001>
module attributes {stable_mosaic.version = 11 : i64} {
  func.func @_cos_dist_sim_kernel(%arg0: i32, %arg1: memref<16x32xf32, #tpu.memory_space<vmem>>, %arg2: memref<16x32xf32, #tpu.memory_space<vmem>>, %arg3: memref<16x1xf32, #tpu.memory_space<vmem>>) attributes {dimension_semantics = [#tpu.dimension_semantics<parallel>], iteration_bounds = array<i64: 1>, scalar_prefetch = 0 : i64, scratch_operands = 0 : i64, tpu.core_type = #tpu.core_type<tc>, window_params = [{transform_indices = @transform_0, window_bounds = array<i64: 16, 32>}, {transform_indices = @transform_1, window_bounds = array<i64: 16, 32>}, {transform_indices = @transform_2, window_bounds = array<i64: 16, 1>}]} {
    %c0 = arith.constant 0 : index
    %c0_0 = arith.constant 0 : index
    %0 = vector.load %arg1[%c0, %c0_0] : memref<16x32xf32, #tpu.memory_space<vmem>>, vector<16x32xf32>
    %c0_1 = arith.constant 0 : index
    %c0_2 = arith.constant 0 : index
    %1 = vector.load %arg2[%c0_1, %c0_2] : memref<16x32xf32, #tpu.memory_space<vmem>>, vector<16x32xf32>
    %2 = arith.mulf %0, %0 : vector<16x32xf32>
    %cst = arith.constant dense<0.000000e+00> : vector<16xf32>
    %3 = vector.multi_reduction <add>, %2, %cst [1] : vector<16x32xf32> to vector<16xf32>
    %4 = vector.shape_cast %3 : vector<16xf32> to vector<16x1xf32>
    %5 = arith.mulf %1, %1 : vector<16x32xf32>
    %cst_3 = arith.constant dense<0.000000e+00> : vector<16xf32>
    %6 = vector.multi_reduction <add>, %5, %cst_3 [1] : vector<16x32xf32> to vector<16xf32>
    %7 = vector.shape_cast %6 : vector<16xf32> to vector<16x1xf32>
    %8 = arith.mulf %0, %1 : vector<16x32xf32>
    %cst_4 = arith.constant dense<0.000000e+00> : vector<16xf32>
    %9 = vector.multi_reduction <add>, %8, %cst_4 [1] : vector<16x32xf32> to vector<16xf32>
    %10 = vector.shape_cast %9 : vector<16xf32> to vector<16x1xf32>
    %cst_5 = arith.constant 1.000000e-24 : f32
    %11 = vector.broadcast %cst_5 : f32 to vector<16x1xf32>
    %12 = arith.maximumf %4, %11 : vector<16x1xf32>
    %13 = math.rsqrt %12 : vector<16x1xf32>
    %cst_6 = arith.constant 1.000000e-24 : f32
    %14 = vector.broadcast %cst_6 : f32 to vector<16x1xf32>
    %15 = arith.maximumf %7, %14 : vector<16x1xf32>
    %16 = math.rsqrt %15 : vector<16x1xf32>
    %17 = arith.mulf %13, %16 : vector<16x1xf32>
    %18 = arith.mulf %10, %17 : vector<16x1xf32>
    %19 = math.sqrt %4 : vector<16x1xf32>
    %20 = arith.mulf %19, %13 : vector<16x1xf32>
    %21 = math.sqrt %7 : vector<16x1xf32>
    %22 = arith.mulf %21, %16 : vector<16x1xf32>
    %cst_7 = arith.constant 9.99999993E-9 : f32
    %23 = vector.broadcast %cst_7 : f32 to vector<16x1xf32>
    %24 = arith.maximumf %20, %23 : vector<16x1xf32>
    %cst_8 = arith.constant 9.99999993E-9 : f32
    %25 = vector.broadcast %cst_8 : f32 to vector<16x1xf32>
    %26 = arith.maximumf %22, %25 : vector<16x1xf32>
    %27 = arith.mulf %24, %26 : vector<16x1xf32>
    %28 = arith.divf %18, %27 : vector<16x1xf32>
    %c0_9 = arith.constant 0 : index
    %c0_10 = arith.constant 0 : index
    %29 = vector.load %arg3[%c0_9, %c0_10] : memref<16x1xf32, #tpu.memory_space<vmem>>, vector<16x1xf32>
    tpu.vector_store %arg3[%c0_9, %c0_10], %28 {strides = array<i32>} : memref<16x1xf32, #tpu.memory_space<vmem>>, vector<16x1xf32>,
    return
  }
  func.func @transform_0(%arg0: i32) -> (i32, i32) {
    %c0_i32 = arith.constant 0 : i32
    %c0_i32_0 = arith.constant 0 : i32
    return %arg0, %c0_i32 : i32, i32
  }
  func.func @transform_1(%arg0: i32) -> (i32, i32) {
    %c0_i32 = arith.constant 0 : i32
    %c0_i32_0 = arith.constant 0 : i32
    return %arg0, %c0_i32 : i32, i32
  }
  func.func @transform_2(%arg0: i32) -> (i32, i32) {
    %c0_i32 = arith.constant 0 : i32
    %c0_i32_0 = arith.constant 0 : i32
    return %arg0, %c0_i32 : i32, i32
  }
}

</mosaic_0001>

<bundles_post_ra>
// kernel: tpu_custom_call.1
= control target key start
LH: loop header
LB: loop body
LE: loop exit
PB: predicated region body
PF: predicated region fallthrough
CT: control target
= control target key end

     0   :  { %7 = vsyncpa [#allocation3], 0  ;;  %s258_s0 = inlined_call_operand.hbm [shape: f32[16,32], index: 0, kind: input, shape index: {}]   ;;  %s259_s1 = inlined_call_operand.hbm [shape: f32[16,32], index: 1, kind: input, shape index: {}]   ;;  %s260_s2 = inlined_call_operand.vmem [shape: f32[16,1], index: 2, kind: output, shape index: {}]  }
   0x1   :  { %8 = vsyncpa [#allocation5], 0  ;;  %s203_s9 = smov [#allocation2]   ;;  %s155_s13 = scalar_lea.hbm %s258_s0, 256 }
   0x2   :  { %s14_s10 = sshll.u32 %s203_s9, 4  ;;  %p156_p0 = scmp.ne.s32.totalorder %s258_s0, %s155_s13  ;;  %s15_s10 = int_to_ptr.vmem [resolvable:$true] %s14_s10 }
   0x3   :  { %p159_p1 = scmp.lt.u32.totalorder %s155_s13, %s258_s0 }
   0x5   :  { %p161_p2 = pnand %p159_p1, %p156_p0 }
   0x7   :  { %164 = shalt.err (!%p161_p2)
}
   0x8   :  { %s165_s18 = scalar_lea.vmem %s15_s10, 256  ;;  %p170_p4 = scmp.lt.s32.totalorder %s15_s10, %s15_s10 }
   0x9   :  { %p166_p3 = scmp.ne.s32.totalorder %s15_s10, %s165_s18  ;;  %p171_p5 = scmp.lt.s32.totalorder %s165_s18, %s165_s18 }
   0xb   :  { %p172_p6 = por %p171_p5, %p170_p4 }
   0xd   :  { %p173_p7 = pnand %p172_p6, %p166_p3 }
   0xf   :  { %176 = shalt.err (!%p173_p7)
}
  0x10   :  { %s204_s19 = smov 128   ;;  %s205_s20 = smov 8  }
  0x11   :  { %20 = dma.hbm_to_vmem [thread:$0]  %s258_s0, 256, %s15_s10, [#allocation3], %s204_s19, %s204_s19, %s205_s20  }
  0x12   :  { %s206_s23 = smov [#allocation4]   ;;  %s177_s27 = scalar_lea.hbm %s259_s1, 256 }
  0x13   :  { %s26_s24 = sshll.u32 %s206_s23, 4  ;;  %p178_p8 = scmp.ne.s32.totalorder %s259_s1, %s177_s27  ;;  %s27_s24 = int_to_ptr.vmem [resolvable:$true] %s26_s24 }
  0x14   :  { %p181_p9 = scmp.lt.u32.totalorder %s177_s27, %s259_s1 }
  0x16   :  { %p183_p10 = pnand %p181_p9, %p178_p8 }
  0x18   :  { %186 = shalt.err (!%p183_p10)
}
  0x19   :  { %s187_s4 = scalar_lea.vmem %s27_s24, 256  ;;  %p192_p12 = scmp.lt.s32.totalorder %s27_s24, %s27_s24 }
  0x1a   :  { %p188_p11 = scmp.ne.s32.totalorder %s27_s24, %s187_s4  ;;  %p193_p13 = scmp.lt.s32.totalorder %s187_s4, %s187_s4 }
  0x1c   :  { %p194_p0 = por %p193_p13, %p192_p12 }
  0x1e   :  { %p195_p1 = pnand %p194_p0, %p188_p11 }
  0x20   :  { %198 = shalt.err (!%p195_p1)
}
  0x21   :  { %32 = dma.hbm_to_vmem [thread:$0]  %s259_s1, 256, %s27_s24, [#allocation5], %s204_s19, %s204_s19, %s205_s20  }
  0x22   :  { %199 = dma.done.wait [#allocation3], 256  }
  0x23   :  { %200 = vsyncadd [#allocation3], 4294967040 }
  0x24   :  { %201 = dma.done.wait [#allocation5], 256  }
  0x25   :  { %202 = vsyncadd [#allocation5], 4294967040  ;;  %v41_v0 = vld [vmem:[#allocation4] sm:$0xff]  ;;  %vm45_vm0 = vcmask 261120   ;;  %v39_v1 = vld [vmem:[#allocation2] sm:$0xff]  ;;  %vm122_vm9 = vcmask 7168  }
  0x26   :  { %v42_v2 = vld [vmem:[#allocation4 + $0x8] sm:$0xff]  ;;  %v52_v3 = vmul.f32 %v41_v0, %v41_v0  ;;  %v43_v4 = vmul.f32 %v39_v1, %v39_v1  ;;  %v40_v6 = vld [vmem:[#allocation2 + $0x8] sm:$0xff]  ;;  %v60_v12 = vmul.f32 %v41_v0, %v39_v1 }
  0x27   :  { %v53_v5 = vmul.f32 %v42_v2, %v42_v2  ;;  %v44_v7 = vmul.f32 %v40_v6, %v40_v6  ;;  %v61_v13 = vmul.f32 %v42_v2, %v40_v6 }
  0x28   :  { %v54_v8 = vsel %vm45_vm0, %v52_v3, 0.0  ;;  %v46_v9 = vsel %vm45_vm0, %v43_v4, 0.0  ;;  %v62_v14 = vsel %vm45_vm0, %v60_v12, 0.0 }
  0x29   :  { %55 = vadd.xlane.f32.xlu1 %v54_v8  ;;  %47 = vadd.xlane.f32.xlu0 %v46_v9  ;;  %v57_v10 = vsel %vm45_vm0, %v53_v5, 0.0  ;;  %v49_v11 = vsel %vm45_vm0, %v44_v7, 0.0  ;;  %v65_v15 = vsel %vm45_vm0, %v61_v13, 0.0 }
  0x2d   :  { %58 = vadd.xlane.f32.xlu1 %v57_v10  ;;  %50 = vadd.xlane.f32.xlu0 %v49_v11 }
  0x31   :  { %63 = vadd.xlane.f32.xlu0 %v62_v14  ;;  %66 = vadd.xlane.f32.xlu1 %v65_v15 }
  0xb6   :  { %v56_v16 = vpop.xlane.xlu1 %55  ;;  %v48_v17 = vpop.xlane.xlu0 %47 }
  0xb7   :  { %135 = vrsqrt.f32 %v56_v16  ;;  %v68_v18 = vmax.f32 %v48_v17, 1e-24  ;;  %v72_v21 = vmax.f32 %v56_v16, 1e-24  ;;  %vm98_vm1 = vcmp.eq.f32.partialorder %v56_v16, inf }
  0xb8   :  { %137 = vrsqrt.f32 %v48_v17  ;;  %v101_v29 = vand.u32 2147483648, %v56_v16  ;;  %vm82_vm2 = vcmp.eq.f32.partialorder %v48_v17, inf  ;;  %v85_v30 = vand.u32 2147483648, %v48_v17 }
  0xb9   :  { %vm100_vm3 = vcmp.eq.f32.partialorder %v56_v16, 0.0  ;;  %vm84_vm4 = vcmp.eq.f32.partialorder %v48_v17, 0.0 }
  0xba   :  { %v59_v19 = vpop.xlane.xlu1 %58  ;;  %v51_v20 = vpop.xlane.xlu0 %50 }
  0xbb   :  { %139 = vrsqrt.f32 %v59_v19  ;;  %v73_v22 = vmax.f32 %v59_v19, 1e-24  ;;  %v69_v23 = vmax.f32 %v51_v20, 1e-24  ;;  %vm105_vm5 = vcmp.eq.f32.partialorder %v59_v19, inf }
  0xbc   :  { %141 = vrsqrt.f32 %v51_v20  ;;  %vm107_vm6 = vcmp.eq.f32.partialorder %v59_v19, 0.0  ;;  %v108_v38 = vand.u32 2147483648, %v59_v19  ;;  %vm89_vm7 = vcmp.eq.f32.partialorder %v51_v20, inf }
  0xbd   :  { %143 = vrsqrt.f32 %v68_v18  ;;  %v92_v42 = vand.u32 2147483648, %v51_v20  ;;  %vm91_vm8 = vcmp.eq.f32.partialorder %v51_v20, 0.0 }
  0xbe   :  { %145 = vrsqrt.f32 %v72_v21  ;;  %v64_v59 = vpop.xlane.xlu0 %63  ;;  %v67_v61 = vpop.xlane.xlu1 %66 }
  0xbf   :  { %147 = vrsqrt.f32 %v73_v22 }
  0xc0   :  { %149 = vrsqrt.f32 %v69_v23 }
  0xc1   :  { %v136_v24 = vpop.eup %135 }
  0xc2   :  { %v138_v25 = vpop.eup %137  ;;  %v97_v26 = vmul.f32 %v136_v24, %v56_v16 }
  0xc3   :  { %v81_v27 = vmul.f32 %v138_v25, %v48_v17 }
  0xc4   :  { %v99_v28 = vsel %vm98_vm1, %v56_v16, %v97_v26 }
  0xc5   :  { %v140_v31 = vpop.eup %139  ;;  %v83_v32 = vsel %vm82_vm2, %v48_v17, %v81_v27  ;;  %v102_v36 = vsel %vm100_vm3, %v101_v29, %v99_v28 }
  0xc6   :  { %v142_v33 = vpop.eup %141  ;;  %v104_v34 = vmul.f32 %v140_v31, %v59_v19  ;;  %v86_v35 = vsel %vm84_vm4, %v85_v30, %v83_v32 }
  0xc7   :  { %v144_v37 = vpop.eup %143  ;;  %v88_v39 = vmul.f32 %v142_v33, %v51_v20 }
  0xc8   :  { %v146_v40 = vpop.eup %145  ;;  %v106_v41 = vsel %vm105_vm5, %v59_v19, %v104_v34  ;;  %v94_v43 = vmul.f32 %v144_v37, %v86_v35 }
  0xc9   :  { %v148_v44 = vpop.eup %147  ;;  %v90_v45 = vsel %vm89_vm7, %v51_v20, %v88_v39  ;;  %v110_v46 = vmul.f32 %v146_v40, %v102_v36  ;;  %v109_v47 = vsel %vm107_vm6, %v108_v38, %v106_v41  ;;  %v76_v58 = vmul.f32 %v146_v40, %v144_v37 }
  0xca   :  { %v150_v48 = vpop.eup %149  ;;  %v112_v49 = vmax.f32 %v94_v43, 1e-08  ;;  %v111_v50 = vmul.f32 %v148_v44, %v109_v47  ;;  %v93_v51 = vsel %vm91_vm8, %v92_v42, %v90_v45 }
  0xcb   :  { %v114_v52 = vmax.f32 %v110_v46, 1e-08  ;;  %v95_v53 = vmul.f32 %v150_v48, %v93_v51  ;;  %v77_v60 = vmul.f32 %v150_v48, %v148_v44  ;;  %v78_v62 = vmul.f32 %v76_v58, %v64_v59 }
  0xcc   :  { %v115_v54 = vmax.f32 %v111_v50, 1e-08 }
  0xcd   :  { %v116_v55 = vmul.f32 %v114_v52, %v112_v49  ;;  %v113_v56 = vmax.f32 %v95_v53, 1e-08  ;;  %v79_v1 = vmul.f32 %v77_v60, %v67_v61 }
  0xcf   :  { %151 = vrcp.f32 %v116_v55  ;;  %v117_v57 = vmul.f32 %v115_v54, %v113_v56 }
  0xd1   :  { %153 = vrcp.f32 %v117_v57 }
  0xd9   :  { %v152_v63 = vpop.eup %151 }
  0xda   :  { %v119_v0 = vmul.f32 %v152_v63, %v78_v62 }
  0xdb   :  { %v154_v2 = vpop.eup %153 }
  0xdc   :  { %123 = vst.msk [vmem:[%s260_s2] sm:$0xff] %vm122_vm9, %v119_v0  ;;  %v121_v3 = vmul.f32 %v154_v2, %v79_v1 }
  0xde   :  { %124 = vst.msk [vmem:[%s260_s2 + $0x8] sm:$0xff] %vm122_vm9, %v121_v3 }
  0xdf   :  { %129 = vsyncpa [#allocation3], 1 }
  0xe0   :  { %130 = vsyncpa [#allocation5], 1 }

</bundles_post_ra>
